<compile_context>
chip_gen: v7x
topology: tpu7x:2x2x1
jax: 0.10.0
libtpu: 0.0.40
codegen_flags: <defaults>
</compile_context>

<pallas_src>
import functools
import math

import jax
import jax.numpy as jnp
from jax import lax
from jax.experimental import pallas as pl
from jax.experimental.pallas import tpu as pltpu


def _round_up(x, m):
    return (x + m - 1) // m * m


def _sublane_multiple(dtype):
    return {4: 8, 2: 16, 1: 32}.get(jnp.dtype(dtype).itemsize, 8)


def _vmem_capacity_bytes():
    try:
        return int(pltpu.get_tpu_info().vmem_capacity_bytes)
    except Exception:
        return 64 * 1024 * 1024  # v7x per-TC capacity: safe lower bound


def _label_smoothing_kernel(tgt_ref, x_ref, loss_ref, *rest, n_rows,
                            tiles_per_split, tile_n, slab_n, padding_idx,
                            confidence, fill, const_term, with_dist, unroll):
    """Processes one (tile_n, V) row block in row slabs of slab_n rows."""
    dist_ref = rest[0] if with_dist else None
    v = x_ref.shape[1]
    c = pl.program_id(0)
    i = pl.program_id(1)
    # Unclamped logical tile index.  For the redundant clamped tile that shows
    # up when the tile count is odd under a 2-way core split, logical row ids
    # land at >= n_rows so its loss contribution is masked to zero (its dist
    # write is an identical overwrite of the last real block).
    logical_tile = c * tiles_per_split + i

    @pl.when(i == 0)
    def _init():
        loss_ref[...] = jnp.zeros_like(loss_ref)

    n_slabs = tile_n // slab_n

    def slab_body(g, acc):
        s0 = pl.multiple_of(g * slab_n, slab_n)
        x = x_ref[pl.ds(s0, slab_n), :].astype(jnp.float32)      # (slab, V)
        tgt = tgt_ref[pl.ds(s0, slab_n), :]                      # (slab, 1)
        col = lax.broadcasted_iota(jnp.int32, (slab_n, v), 1)
        is_tgt = col == tgt

        if with_dist:
            # fill_() + scatter_(confidence) + padding col/row zeroing fused.
            valid = jnp.logical_and(tgt != padding_idx, col != padding_idx)
            td = jnp.where(valid, jnp.where(is_tgt, confidence, fill), 0.0)
            dist_ref[pl.ds(s0, slab_n), :] = td.astype(dist_ref.dtype)

        # Algebraic KLDiv: sum_cols td*(log td - x)
        #   = const_term - [(conf-fill)*x[tgt] + fill*(rowsum(x) - x[pad])]
        x_tgt = jnp.sum(jnp.where(is_tgt, x, 0.0), axis=-1, keepdims=True)
        x_sum = jnp.sum(x, axis=-1, keepdims=True)
        if padding_idx == 0:
            x_pad = x[:, 0:1]
        else:
            x_pad = jnp.sum(jnp.where(col == padding_idx, x, 0.0),
                            axis=-1, keepdims=True)

        row_id = (logical_tile * tile_n + s0
                  + lax.broadcasted_iota(jnp.int32, (slab_n, 1), 0))
        row_ok = jnp.logical_and(row_id < n_rows, tgt != padding_idx)
        loss_rows = jnp.where(
            row_ok,
            const_term - ((confidence - fill) * x_tgt + fill * (x_sum - x_pad)),
            0.0)
        return acc + loss_rows

    acc = lax.fori_loop(0, n_slabs, slab_body,
                        jnp.zeros((slab_n, 1), jnp.float32), unroll=unroll)
    tile_sum = jnp.sum(acc)

    # Scatter the per-tile scalar into element [0, 0] of the per-split block.
    onehot = jnp.logical_and(
        lax.broadcasted_iota(jnp.int32, (8, 128), 0) == 0,
        lax.broadcasted_iota(jnp.int32, (8, 128), 1) == 0)
    loss_ref[...] += jnp.where(onehot, tile_sum, 0.0)


def label_smoothing_loss(x, target, *, size, padding_idx=0, smoothing=0.0,
                         tile_n=None, return_true_dist=True, dist_dtype=None):
    """Matches PyTorch LabelSmoothing.forward (loss) and self.true_dist."""
    n, v = x.shape
    assert v == size, "x.shape[1] must equal `size`"
    assert size > 2 or smoothing == 0.0, "smoothing>0 requires size>2"
    if dist_dtype is None:
        # Fast path hint: pass dist_dtype=jnp.bfloat16 to halve dist traffic.
        dist_dtype = x.dtype

    confidence = 1.0 - smoothing
    fill = smoothing / (size - 2) if size > 2 else 0.0
    const_term = ((confidence * math.log(confidence) if confidence > 0 else 0.0)
                  + (size - 2) * (fill * math.log(fill) if fill > 0 else 0.0))

    x_item = jnp.dtype(x.dtype).itemsize
    d_item = jnp.dtype(dist_dtype).itemsize
    sub = _sublane_multiple(x.dtype)
    if return_true_dist:
        sub = max(sub, _sublane_multiple(dist_dtype))

    vmem_cap = _vmem_capacity_bytes()
    bytes_per_row = v * x_item

    # ---- tiling: memory-bound -> large lane-dense row tiles ---------------
    if tile_n is None:
        budget = min(4 * 1024 * 1024, vmem_cap // 12)        # per x block
        tile_n = (budget // max(bytes_per_row, 1)) // sub * sub
        tile_n = max(sub, min(4096, tile_n))
    tile_n = max(sub, _round_up(tile_n, sub))
    tile_n = min(tile_n, _round_up(n, sub))

    # Row slab inside the kernel (~32 KiB of x per slab -> bounded live set).
    slab_n = max(sub, min(tile_n,
                          (32 * 1024 // max(bytes_per_row, 1)) // sub * sub))
    tile_n = _round_up(tile_n, slab_n)

    n_tiles = pl.cdiv(n, tile_n)
    num_splits = 2 if n_tiles >= 2 else 1        # megacore split (v7x: 2 TCs)
    tiles_per_split = pl.cdiv(n_tiles, num_splits)
    clamp_needed = num_splits * tiles_per_split > n_tiles

    tgt = target.reshape(n, 1).astype(jnp.int32)

    def row_map(c, i):
        t = c * tiles_per_split + i
        if clamp_needed:
            t = jnp.minimum(t, n_tiles - 1)       # redundant tile -> last block
        return (t, 0)

    kernel = functools.partial(
        _label_smoothing_kernel,
        n_rows=n, tiles_per_split=tiles_per_split, tile_n=tile_n,
        slab_n=slab_n, padding_idx=padding_idx,
        confidence=float(confidence), fill=float(fill),
        const_term=float(const_term), with_dist=return_true_dist,
        unroll=max(1, min(2, tile_n // slab_n)))

    out_shape = [jax.ShapeDtypeStruct((num_splits * 8, 128), jnp.float32)]
    out_specs = [pl.BlockSpec((8, 128), lambda c, i: (c, 0))]
    if return_true_dist:
        out_shape.append(jax.ShapeDtypeStruct((n, v), dist_dtype))
        out_specs.append(pl.BlockSpec((tile_n, v), row_map))

    # vmem limit: real double-buffered working set, capped to the chip.
    x_block = tile_n * v * x_item
    tgt_block = tile_n * 128 * 4                  # lane-padded int32 in VMEM
    dist_block = tile_n * v * d_item if return_true_dist else 0
    working = 2 * (x_block + tgt_block + dist_block) + (2 << 20)
    vmem_limit = int(min(max(working, 16 << 20), int(0.75 * vmem_cap)))

    bytes_accessed = (n * v * x_item + n * 4 + num_splits * 8 * 128 * 4
                      + (n * v * d_item if return_true_dist else 0))

    outs = pl.pallas_call(
        kernel,
        out_shape=tuple(out_shape),
        grid_spec=pltpu.PrefetchScalarGridSpec(
            num_scalar_prefetch=0,
            grid=(num_splits, tiles_per_split),
            in_specs=[
                pl.BlockSpec((tile_n, 1), row_map),   # target ids
                pl.BlockSpec((tile_n, v), row_map),   # log-probabilities
            ],
            out_specs=out_specs,
        ),
        compiler_params=pltpu.CompilerParams(
            dimension_semantics=("parallel", "arbitrary"),
            vmem_limit_bytes=vmem_limit),
        cost_estimate=pl.CostEstimate(
            flops=5 * n * v, transcendentals=0,
            bytes_accessed=int(bytes_accessed)),
    )(tgt, x)

    loss = jnp.sum(outs[0])                       # tiny final reduction
    if return_true_dist:
        return loss, outs[1]
    return loss


def _reference(x, target, *, size, padding_idx, smoothing):
    confidence = 1.0 - smoothing
    fill = smoothing / (size - 2)
    n, v = x.shape
    td = jnp.full((n, v), fill, jnp.float32)
    td = td.at[jnp.arange(n), target].set(confidence)
    td = td.at[:, padding_idx].set(0.0)
    td = jnp.where((target == padding_idx)[:, None], 0.0, td)
    safe = jnp.where(td > 0, td, 1.0)
    loss = jnp.sum(jnp.where(td > 0, td * (jnp.log(safe) - x), 0.0))
    return loss, td


if __name__ == "__main__":
    SMOOTHING = 0.1
    PAD = 0

    key = jax.random.PRNGKey(0)
    k1, k2, k3, k4 = jax.random.split(key, 4)

    # -- case 1: single tile, loss + true_dist --------------------------------
    N1, V1 = 16, 128
    x1 = jax.nn.log_softmax(jax.random.normal(k1, (N1, V1), jnp.float32), -1)
    t1 = jax.random.randint(k2, (N1,), 0, V1, jnp.int32).at[3].set(PAD)

    loss1, dist1 = label_smoothing_loss(
        x1, t1, size=V1, padding_idx=PAD, smoothing=SMOOTHING)
    jax.block_until_ready((loss1, dist1))
    rl1, rd1 = _reference(x1, t1, size=V1, padding_idx=PAD, smoothing=SMOOTHING)
    assert jnp.allclose(loss1, rl1, rtol=1e-4, atol=1e-4), (loss1, rl1)
    assert jnp.allclose(dist1, rd1, rtol=1e-6, atol=1e-6)

    # -- case 2: ragged tail (n % tile_n != 0), odd tile count under the
    #            2-way core split (one clamped redundant tile), loss + dist ---
    N2, V2 = 20, 128
    x2 = jax.nn.log_softmax(jax.random.normal(k3, (N2, V2), jnp.float32), -1)
    t2 = (jax.random.randint(k4, (N2,), 0, V2, jnp.int32)
          .at[7].set(PAD).at[19].set(PAD))

    loss2, dist2 = label_smoothing_loss(
        x2, t2, size=V2, padding_idx=PAD, smoothing=SMOOTHING, tile_n=8)
    jax.block_until_ready((loss2, dist2))
    rl2, rd2 = _reference(x2, t2, size=V2, padding_idx=PAD, smoothing=SMOOTHING)
    assert jnp.allclose(loss2, rl2, rtol=1e-4, atol=1e-4), (loss2, rl2)
    assert jnp.allclose(dist2, rd2, rtol=1e-6, atol=1e-6)

    # -- case 3: loss-only fast path, smoothing = 0 ----------------------------
    loss3 = label_smoothing_loss(
        x2, t2, size=V2, padding_idx=PAD, smoothing=0.0, tile_n=8,
        return_true_dist=False)
    jax.block_until_ready(loss3)
    rl3, _ = _reference(x2, t2, size=V2, padding_idx=PAD, smoothing=0.0)
    assert jnp.allclose(loss3, rl3, rtol=1e-4, atol=1e-4), (loss3, rl3)

    print("KERNEL_OK")
</pallas_src>

<mosaic_0001>
module attributes {stable_mosaic.version = 11 : i64} {
  func.func @_label_smoothing_kernel(%arg0: i32, %arg1: i32, %arg2: memref<16x1xi32, #tpu.memory_space<vmem>>, %arg3: memref<16x128xf32, #tpu.memory_space<vmem>>, %arg4: memref<8x128xf32, #tpu.memory_space<vmem>>, %arg5: memref<16x128xf32, #tpu.memory_space<vmem>>) attributes {dimension_semantics = [#tpu.dimension_semantics<parallel>, #tpu.dimension_semantics<arbitrary>], iteration_bounds = array<i64: 1, 1>, scalar_prefetch = 0 : i64, scratch_operands = 0 : i64, tpu.core_type = #tpu.core_type<tc>, window_params = [{transform_indices = @transform_0, window_bounds = array<i64: 16, 1>}, {transform_indices = @transform_1, window_bounds = array<i64: 16, 128>}, {transform_indices = @transform_2, window_bounds = array<i64: 8, 128>}, {transform_indices = @transform_3, window_bounds = array<i64: 16, 128>}]} {
    %c1_i32 = arith.constant 1 : i32
    %0 = arith.muli %arg0, %c1_i32 : i32
    %1 = arith.addi %0, %arg1 : i32
    %c0_i32 = arith.constant 0 : i32
    %2 = arith.cmpi eq, %arg1, %c0_i32 : i32
    %3 = arith.extui %2 : i1 to i32
    %c0_i32_0 = arith.constant 0 : i32
    %4 = arith.cmpi ne, %3, %c0_i32_0 : i32
    scf.if %4 {
      %cst_28 = arith.constant 0.000000e+00 : f32
      %73 = vector.broadcast %cst_28 : f32 to vector<8x128xf32>
      %c0_29 = arith.constant 0 : index
      %c0_30 = arith.constant 0 : index
      %74 = vector.load %arg4[%c0_29, %c0_30] : memref<8x128xf32, #tpu.memory_space<vmem>>, vector<8x128xf32>
      tpu.vector_store %arg4[%c0_29, %c0_30], %73 {strides = array<i32>} : memref<8x128xf32, #tpu.memory_space<vmem>>, vector<8x128xf32>,
    } else {
    }
    %cst = arith.constant 0.000000e+00 : f32
    %5 = vector.broadcast %cst : f32 to vector<16x1xf32>
    %c0_i32_1 = arith.constant 0 : i32
    %c16_i32 = arith.constant 16 : i32
    %6 = arith.muli %c0_i32_1, %c16_i32 : i32
    %7 = tpu.assume_multiple %6, 16 : i32
    %8 = arith.index_cast %7 : i32 to index
    %c0 = arith.constant 0 : index
    %9 = vector.load %arg3[%8, %c0] : memref<16x128xf32, #tpu.memory_space<vmem>>, vector<16x128xf32>
    %10 = arith.index_cast %7 : i32 to index
    %c0_2 = arith.constant 0 : index
    %11 = vector.load %arg2[%10, %c0_2] : memref<16x1xi32, #tpu.memory_space<vmem>>, vector<16x1xi32>
    %12 = tpu.iota {dimensions = array<i32: 1>} : vector<16x128xi32>
    %13 = vector.broadcast %11 : vector<16x1xi32> to vector<16x128xi32>
    %14 = arith.cmpi eq, %12, %13 : vector<16x128xi32>
    %c0_i32_3 = arith.constant 0 : i32
    %15 = vector.broadcast %c0_i32_3 : i32 to vector<16x1xi32>
    %16 = arith.cmpi ne, %11, %15 : vector<16x1xi32>
    %c0_i32_4 = arith.constant 0 : i32
    %17 = vector.broadcast %c0_i32_4 : i32 to vector<16x128xi32>
    %18 = arith.cmpi ne, %12, %17 : vector<16x128xi32>
    %19 = vector.broadcast %16 : vector<16x1xi1> to vector<16x128xi1>
    %20 = arith.andi %19, %18 : vector<16x128xi1>
    %cst_5 = arith.constant 0.899999976 : f32
    %cst_6 = arith.constant 7.93650805E-4 : f32
    %21 = vector.broadcast %cst_5 : f32 to vector<16x128xf32>
    %22 = vector.broadcast %cst_6 : f32 to vector<16x128xf32>
    %23 = arith.select %14, %21, %22 : vector<16x128xi1>, vector<16x128xf32>
    %cst_7 = arith.constant 0.000000e+00 : f32
    %24 = vector.broadcast %cst_7 : f32 to vector<16x128xf32>
    %25 = arith.select %20, %23, %24 : vector<16x128xi1>, vector<16x128xf32>
    %26 = arith.index_cast %7 : i32 to index
    %c0_8 = arith.constant 0 : index
    %27 = vector.load %arg5[%26, %c0_8] : memref<16x128xf32, #tpu.memory_space<vmem>>, vector<16x128xf32>
    tpu.vector_store %arg5[%26, %c0_8], %25 {strides = array<i32>} : memref<16x128xf32, #tpu.memory_space<vmem>>, vector<16x128xf32>,
    %cst_9 = arith.constant 0.000000e+00 : f32
    %28 = vector.broadcast %cst_9 : f32 to vector<16x128xf32>
    %29 = arith.select %14, %9, %28 : vector<16x128xi1>, vector<16x128xf32>
    %cst_10 = arith.constant dense<0.000000e+00> : vector<16xf32>
    %30 = vector.multi_reduction <add>, %29, %cst_10 [1] : vector<16x128xf32> to vector<16xf32>
    %31 = vector.shape_cast %30 : vector<16xf32> to vector<16x1xf32>
    %cst_11 = arith.constant dense<0.000000e+00> : vector<16xf32>
    %32 = vector.multi_reduction <add>, %9, %cst_11 [1] : vector<16x128xf32> to vector<16xf32>
    %33 = vector.shape_cast %32 : vector<16xf32> to vector<16x1xf32>
    %34 = vector.extract_strided_slice %9 {offsets = [0, 0], sizes = [16, 1], strides = [1, 1]} : vector<16x128xf32> to vector<16x1xf32>
    %c16_i32_12 = arith.constant 16 : i32
    %35 = arith.muli %1, %c16_i32_12 : i32
    %36 = arith.addi %35, %7 : i32
    %37 = tpu.iota {dimensions = array<i32: 0>} : vector<16x1xi32>
    %38 = vector.broadcast %36 : i32 to vector<16x1xi32>
    %39 = arith.addi %38, %37 : vector<16x1xi32>
    %c16_i32_13 = arith.constant 16 : i32
    %40 = vector.broadcast %c16_i32_13 : i32 to vector<16x1xi32>
    %41 = arith.cmpi slt, %39, %40 : vector<16x1xi32>
    %c0_i32_14 = arith.constant 0 : i32
    %42 = vector.broadcast %c0_i32_14 : i32 to vector<16x1xi32>
    %43 = arith.cmpi ne, %11, %42 : vector<16x1xi32>
    %44 = arith.andi %41, %43 : vector<16x1xi1>
    %cst_15 = arith.constant 0.89920634 : f32
    %45 = vector.broadcast %cst_15 : f32 to vector<16x1xf32>
    %46 = arith.mulf %45, %31 : vector<16x1xf32>
    %47 = arith.subf %33, %34 : vector<16x1xf32>
    %cst_16 = arith.constant 7.93650805E-4 : f32
    %48 = vector.broadcast %cst_16 : f32 to vector<16x1xf32>
    %49 = arith.mulf %48, %47 : vector<16x1xf32>
    %50 = arith.addf %46, %49 : vector<16x1xf32>
    %cst_17 = arith.constant -0.808711171 : f32
    %51 = vector.broadcast %cst_17 : f32 to vector<16x1xf32>
    %52 = arith.subf %51, %50 : vector<16x1xf32>
    %cst_18 = arith.constant 0.000000e+00 : f32
    %53 = vector.broadcast %cst_18 : f32 to vector<16x1xf32>
    %54 = arith.select %44, %52, %53 : vector<16x1xi1>, vector<16x1xf32>
    %55 = arith.addf %5, %54 : vector<16x1xf32>
    %c1_i32_19 = arith.constant 1 : i32
    %56 = vector.shape_cast %55 : vector<16x1xf32> to vector<1x16x1xf32>
    %cst_20 = arith.constant dense<0.000000e+00> : vector<1xf32>
    %57 = vector.multi_reduction <add>, %56, %cst_20 [1, 2] : vector<1x16x1xf32> to vector<1xf32>
    %58 = vector.shape_cast %57 : vector<1xf32> to vector<1x1x1xf32>
    %59 = vector.extract %58[0, 0, 0] : f32 from vector<1x1x1xf32>
    %60 = tpu.iota {dimensions = array<i32: 0>} : vector<8x128xi32>
    %c0_i32_21 = arith.constant 0 : i32
    %61 = vector.broadcast %c0_i32_21 : i32 to vector<8x128xi32>
    %62 = arith.cmpi eq, %60, %61 : vector<8x128xi32>
    %63 = tpu.iota {dimensions = array<i32: 1>} : vector<8x128xi32>
    %c0_i32_22 = arith.constant 0 : i32
    %64 = vector.broadcast %c0_i32_22 : i32 to vector<8x128xi32>
    %65 = arith.cmpi eq, %63, %64 : vector<8x128xi32>
    %66 = arith.andi %62, %65 : vector<8x128xi1>
    %c0_23 = arith.constant 0 : index
    %c0_24 = arith.constant 0 : index
    %67 = vector.load %arg4[%c0_23, %c0_24] : memref<8x128xf32, #tpu.memory_space<vmem>>, vector<8x128xf32>
    %cst_25 = arith.constant 0.000000e+00 : f32
    %68 = vector.broadcast %59 : f32 to vector<8x128xf32>
    %69 = vector.broadcast %cst_25 : f32 to vector<8x128xf32>
    %70 = arith.select %66, %68, %69 : vector<8x128xi1>, vector<8x128xf32>
    %71 = arith.addf %67, %70 : vector<8x128xf32>
    %c0_26 = arith.constant 0 : index
    %c0_27 = arith.constant 0 : index
    %72 = vector.load %arg4[%c0_26, %c0_27] : memref<8x128xf32, #tpu.memory_space<vmem>>, vector<8x128xf32>
    tpu.vector_store %arg4[%c0_26, %c0_27], %71 {strides = array<i32>} : memref<8x128xf32, #tpu.memory_space<vmem>>, vector<8x128xf32>,
    return
  }
  func.func @transform_0(%arg0: i32, %arg1: i32) -> (i32, i32) {
    %c1_i32 = arith.constant 1 : i32
    %0 = arith.muli %arg0, %c1_i32 : i32
    %1 = arith.addi %0, %arg1 : i32
    %c0_i32 = arith.constant 0 : i32
    %c0_i32_0 = arith.constant 0 : i32
    return %1, %c0_i32 : i32, i32
  }
  func.func @transform_1(%arg0: i32, %arg1: i32) -> (i32, i32) {
    %c1_i32 = arith.constant 1 : i32
    %0 = arith.muli %arg0, %c1_i32 : i32
    %1 = arith.addi %0, %arg1 : i32
    %c0_i32 = arith.constant 0 : i32
    %c0_i32_0 = arith.constant 0 : i32
    return %1, %c0_i32 : i32, i32
  }
  func.func @transform_2(%arg0: i32, %arg1: i32) -> (i32, i32) {
    %c0_i32 = arith.constant 0 : i32
    %c0_i32_0 = arith.constant 0 : i32
    return %arg0, %c0_i32 : i32, i32
  }
  func.func @transform_3(%arg0: i32, %arg1: i32) -> (i32, i32) {
    %c1_i32 = arith.constant 1 : i32
    %0 = arith.muli %arg0, %c1_i32 : i32
    %1 = arith.addi %0, %arg1 : i32
    %c0_i32 = arith.constant 0 : i32
    %c0_i32_0 = arith.constant 0 : i32
    return %1, %c0_i32 : i32, i32
  }
}

</mosaic_0001>

<bundles_post_ra>
// kernel: tpu_custom_call.1
= control target key start
LH: loop header
LB: loop body
LE: loop exit
PB: predicated region body
PF: predicated region fallthrough
CT: control target
= control target key end

     0   :  { %9 = vsyncpa [#allocation3], 0  ;;  %v264_v2 = vmov 0   ;;  %s346_s0 = inlined_call_operand.vmem [shape: s32[16,1], index: 0, kind: input, shape index: {}]   ;;  %s347_s1 = inlined_call_operand.vmem [shape: f32[16,128], index: 1, kind: input, shape index: {}]   ;;  %s348_s2 = inlined_call_operand.hbm [shape: f32[8,128], index: 2, kind: output, shape index: {0}]   ;;  %s349_s3 = inlined_call_operand.hbm [shape: f32[16,128], index: 3, kind: output, shape index: {1}]  }
   0x1   :  { %v69_v0 = vld [vmem:[%s346_s0] sm:$0xff]  ;;  %214 = vset.pattern.permute.xlu0 %v264_v2 }
   0x2   :  { %v67_v1 = vld [vmem:[%s347_s1] sm:$0xff] }
   0x3   :  { %108 = vadd.xlane.f32.xlu1 %v67_v1 }
   0x4   :  { %10 = vsyncpa [#allocation5], 0  ;;  %74 = vperm.xlu0 %214, %v69_v0   ;;  %215 = vset.pattern.permute.xlu1 %v264_v2  ;;  %v70_v3 = vld [vmem:[%s346_s0 + $0x8] sm:$0xff]  ;;  %v71_v5 = vlaneseq  ;;  %vm81_vm2 = vcmp.ne.s32.totalorder %v69_v0, 0  ;;  %vm138_vm4 = vcmask 7168   ;;  %s266_s0 = smov [#allocation4]  }
   0x5   :  { %v68_v4 = vld [vmem:[%s347_s1 + $0x8] sm:$0xff]  ;;  %vm82_vm3 = vcmp.ne.s32.totalorder %v70_v3, 0  ;;  %v84_v30 = vsel %vm81_vm2, 1, %v264_v2  ;;  %v265_v37 = vmov 0.0007936508   ;;  %s178_s1 = sshll.u32 %s266_s0, 4  ;;  %s179_s1 = int_to_ptr.vmem [resolvable:$true] %s178_s1 }
   0x6   :  { %v303_v6 = vand.u32 127, %v71_v5  ;;  %v85_v31 = vsel %vm82_vm3, 1, %v264_v2  ;;  %s216_s20 = scalar_lea.vmem %s179_s1, 256  ;;  %p221_p1 = scmp.lt.s32.totalorder %s179_s1, %s179_s1 }
   0x7   :  { %110 = vadd.xlane.f32.xlu1 %v68_v4  ;;  %p217_p0 = scmp.ne.s32.totalorder %s179_s1, %s216_s20  ;;  %p222_p2 = scmp.lt.s32.totalorder %s216_s20, %s216_s20 }
   0x8   :  { %77 = vperm.xlu0 %214, %v70_v3   ;;  %vm83_vm5 = vcmp.ne.s32.totalorder %v303_v6, 0 }
   0x9   :  { %p223_p3 = por %p222_p2, %p221_p1 }
   0xb   :  { %p224_p4 = pnand %p223_p3, %p217_p0 }
  0x83   :  { %v75_v7 = vpop.permute.xlu0 %74 }
  0x84   :  { %vm79_vm0 = vcmp.eq.s32.totalorder %v303_v6, %v75_v7 }
  0x85   :  { %v102_v8 = vsel %vm79_vm0, %v67_v1, 0.0  ;;  %v96_v38 = vsel %vm79_vm0, 0.9, %v265_v37 }
  0x86   :  { %104 = vadd.xlane.f32.xlu0 %v102_v8 }
  0x87   :  { %v78_v9 = vpop.permute.xlu0 %77 }
  0x88   :  { %vm80_vm1 = vcmp.eq.s32.totalorder %v303_v6, %v78_v9 }
  0x89   :  { %v103_v10 = vsel %vm80_vm1, %v68_v4, 0.0  ;;  %v97_v43 = vsel %vm80_vm1, 0.9, %v265_v37 }
  0x8a   :  { %106 = vadd.xlane.f32.xlu1 %v103_v10 }
  0x90   :  { %v109_v11 = vpop.xlane.xlu1 %108 }
  0x91   :  { %v126_v12 = vsub.f32 %v109_v11, %v67_v1 }
  0x93   :  { %v128_v15 = vmul.f32 0.0007936508, %v126_v12 }
  0x94   :  { %v111_v13 = vpop.xlane.xlu1 %110 }
  0x95   :  { %v127_v16 = vsub.f32 %v111_v13, %v68_v4 }
  0x97   :  { %v129_v20 = vmul.f32 0.0007936508, %v127_v16 }
 0x113   :  { %v105_v14 = vpop.xlane.xlu0 %104 }
 0x114   :  { %v124_v17 = vmul.f32 0.89920634, %v105_v14 }
 0x116   :  { %v130_v18 = vadd.f32 %v128_v15, %v124_v17 }
 0x117   :  { %v107_v19 = vpop.xlane.xlu1 %106 }
 0x118   :  { %v132_v21 = vsub.f32 -0.8087112, %v130_v18  ;;  %v125_v22 = vmul.f32 0.89920634, %v107_v19 }
 0x11a   :  { %v131_v23 = vadd.f32 %v129_v20, %v125_v22  ;;  %v134_v25 = vsel %vm81_vm2, %v132_v21, 0.0 }
 0x11b   :  { %v139_v27 = vsel %vm138_vm4, %v134_v25, 0.0 }
 0x11c   :  { %v133_v24 = vsub.f32 -0.8087112, %v131_v23 }
 0x11e   :  { %v135_v26 = vsel %vm82_vm3, %v133_v24, 0.0 }
 0x11f   :  { %v140_v28 = vsel %vm138_vm4, %v135_v26, 0.0 }
 0x120   :  { %v141_v29 = vadd.f32 %v140_v28, %v139_v27 }
 0x122   :  { %142 = vadd.xlane.f32.xlu1 %v141_v29 }
 0x133   :  { %87 = vperm.xlu1 %215, %v84_v30  }
 0x137   :  { %90 = vperm.xlu1 %215, %v85_v31  }
 0x1af   :  { %v143_v32 = vpop.xlane.xlu1 %142 }
 0x1b0   :  { %v144_v33 = vrot.slane %v143_v32, 4 }
 0x1b2   :  { %v145_v34 = vadd.f32 %v144_v33, %v143_v32 }
 0x1b3   :  { %v88_v35 = vpop.permute.xlu1 %87 }
 0x1b4   :  { %v146_v36 = vrot.slane %v145_v34, 2  ;;  %vm92_vm6 = vcmp.eq.s32.totalorder %v88_v35, 1 }
 0x1b5   :  { %vm94_vm7 = vmand %vm92_vm6, %vm83_vm5 }
 0x1b6   :  { %v98_v39 = vsel %vm94_vm7, %v96_v38, 0.0  ;;  %v147_v40 = vadd.f32 %v146_v36, %v145_v34 }
 0x1b7   :  { %100 = vst [vmem:[#allocation4] sm:$0xff] %v98_v39  ;;  %v91_v41 = vpop.permute.xlu1 %90 }
 0x1b8   :  { %vm93_vm8 = vcmp.eq.s32.totalorder %v91_v41, 1  ;;  %v148_v42 = vrot.slane %v147_v40, 1 }
 0x1b9   :  { %vm95_vm9 = vmand %vm93_vm8, %vm83_vm5 }
 0x1ba   :  { %v99_v44 = vsel %vm95_vm9, %v97_v43, 0.0  ;;  %v149_v45 = vadd.f32 %v148_v42, %v147_v40 }
 0x1bb   :  { %101 = vst [vmem:[#allocation4 + $0x8] sm:$0xff] %v99_v44 }
 0x1bc   :  { %205 = vpush %v149_v45 }
 0x1bd   :  { %227 = shalt.err (!%p224_p4)
}
 0x1be   :  { %s228_s23 = scalar_lea.hbm %s349_s3, 256 }
 0x1bf   :  { %p229_p5 = scmp.ne.s32.totalorder %s349_s3, %s228_s23  ;;  %p232_p6 = scmp.lt.u32.totalorder %s228_s23, %s349_s3 }
 0x1c1   :  { %p234_p7 = pnand %p232_p6, %p229_p5 }
 0x1c3   :  { %237 = shalt.err (!%p234_p7)
}
 0x1c4   :  { %s267_s28 = smov 128   ;;  %s268_s29 = smov 8   ;;  %v115_v46 = vshrl.u32 %v71_v5, 7  ;;  %vm152_vm11 = vcmp.eq.s32.totalorder %v303_v6, 0 }
 0x1c5   :  { %184 = dma.vmem_to_hbm [thread:$0]  %s179_s1, 256, %s349_s3, [#allocation5], %s267_s28, %s267_s28, %s268_s29  }
 0x1c6   :  { %vm151_vm10 = vcmp.eq.s32.totalorder %v115_v46, 0  ;;  %s269_s6 = smov [#allocation2]  }
 0x1c7   :  { %vm153_vm12 = vmand %vm151_vm10, %vm152_vm11  ;;  %s165_s7 = sshll.u32 %s269_s6, 4  ;;  %s166_s7 = int_to_ptr.vmem [resolvable:$true] %s165_s7 }
 0x1c8   :  { %s238_s8 = scalar_lea.vmem %s166_s7, 128  ;;  %p243_p9 = scmp.lt.s32.totalorder %s166_s7, %s166_s7 }
 0x1c9   :  { %p239_p8 = scmp.ne.s32.totalorder %s166_s7, %s238_s8  ;;  %p244_p10 = scmp.lt.s32.totalorder %s238_s8, %s238_s8 }
 0x1cb   :  { %p245_p11 = por %p244_p10, %p243_p9 }
 0x1cd   :  { %p246_p12 = pnand %p245_p11, %p239_p8 }
 0x1ed   :  { %s206_s5 = spop %205 }
 0x1ee   :  { %v155_v47 = vstv %s206_s5 }
 0x1ef   :  { %v156_v48 = vsel %vm153_vm12, %v155_v47, 0.0 }
 0x1f0   :  { %158 = vst [vmem:[#allocation2] sm:$0xff] %v156_v48 }
 0x1f1   :  { %249 = shalt.err (!%p246_p12)
}
 0x1f2   :  { %s250_s10 = scalar_lea.hbm %s348_s2, 128 }
 0x1f3   :  { %p251_p13 = scmp.ne.s32.totalorder %s348_s2, %s250_s10  ;;  %p254_p0 = scmp.lt.u32.totalorder %s250_s10, %s348_s2 }
 0x1f5   :  { %p256_p1 = pnand %p254_p0, %p251_p13 }
 0x1f7   :  { %259 = shalt.err (!%p256_p1)
}
 0x1f8   :  { %168 = dma.vmem_to_hbm [thread:$0]  %s166_s7, 128, %s348_s2, [#allocation3]  }
 0x1f9   :  { %260 = dma.done.wait [#allocation3], 128  }
 0x1fa   :  { %261 = vsyncadd [#allocation3], 4294967168 }
 0x1fb   :  { %262 = dma.done.wait [#allocation5], 256  }
 0x1fc   :  { %263 = vsyncadd [#allocation5], 4294967040 }
 0x1fd   :  { %191 = vsyncpa [#allocation3], 1 }
 0x1fe   :  { %192 = vsyncpa [#allocation5], 1 }

</bundles_post_ra>
